<compile_context>
chip_gen: v7x
topology: tpu7x:2x2x1
jax: 0.10.0
libtpu: 0.0.40
codegen_flags: <defaults>
</compile_context>

<pallas_src>
import jax
import jax.numpy as jnp
from jax.experimental import pallas as pl
from jax.experimental.pallas import tpu as pltpu


_TILE_BYTES = 8 * 1024 * 1024     # per-tile byte budget (in+out double-buffered -> ~32 MiB VMEM max)
_MIN_GRID_STEPS = 8               # aim for >= ~8 steps: v7x megacore split + pipeline overlap
_VMEM_CAP = 48 * 1024 * 1024      # never request more scoped VMEM than this (v7x physical = 64 MiB)
_VMEM_FLOOR = 16 * 1024 * 1024


def _round_up(a: int, b: int) -> int:
    return ((a + b - 1) // b) * b


# ---------------- Pallas kernel (backward only) ----------------

def _neg_scale_kernel(scale_ref, g_ref, o_ref):
    # grad_input = (-alpha) * grad_output. scale_ref is a (1,) f32 SMEM scalar
    # (runtime value -> no retrace when alpha is annealed); the multiply is free
    # VPU filler under an HBM-bound stream.
    o_ref[...] = (g_ref[...] * scale_ref[0]).astype(o_ref.dtype)


def _neg_scale(g, alpha):
    """Compute (-alpha) * g with a tiled, pipelined Pallas TPU kernel."""
    orig_shape, dtype = g.shape, g.dtype
    n = int(g.size)
    if n == 0:
        return g

    neg_alpha = -jnp.asarray(alpha, dtype=jnp.float32)

    # Lane-dense, zero-copy reshape: widest lane count that divides n.
    lane_w = next((w for w in (1024, 512, 256, 128) if n % w == 0), 0)
    if lane_w == 0:
        # Irregular total size: plain XLA elementwise multiply is already at the
        # 2n-byte HBM roofline; padding to a lane multiple would ~triple traffic.
        return g * neg_alpha.astype(dtype)

    itemsize = jnp.dtype(dtype).itemsize
    pack = max(8, 32 // itemsize)         # native sublane pack: 8 f32 / 16 bf16 / 32 int8-fp8
    m = n // lane_w
    g2d = g.reshape(m, lane_w)            # bitcast reshape, no data movement

    if m <= pack:
        tm = m                            # block == full sublane extent (always a legal block)
    else:
        rows_budget = max(pack, (_TILE_BYTES // (lane_w * itemsize)) // pack * pack)
        split_rows = _round_up(pl.cdiv(m, _MIN_GRID_STEPS), pack)
        tm = max(pack, min(rows_budget, split_rows))

    grid = (pl.cdiv(m, tm),)              # trailing block may be partial (masked) - no row padding
    tile_bytes = tm * lane_w * itemsize
    vmem_limit = int(max(_VMEM_FLOOR, min(_VMEM_CAP, 4 * tile_bytes + (4 << 20))))

    out2d = pl.pallas_call(
        _neg_scale_kernel,
        out_shape=jax.ShapeDtypeStruct((m, lane_w), dtype),
        grid=grid,
        in_specs=[
            pl.BlockSpec(memory_space=pltpu.MemorySpace.SMEM),   # (1,) -alpha scalar
            pl.BlockSpec((tm, lane_w), lambda i: (i, 0)),
        ],
        out_specs=pl.BlockSpec((tm, lane_w), lambda i: (i, 0)),
        input_output_aliases={1: 0},      # overwrite the cotangent buffer in place
        compiler_params=pltpu.CompilerParams(
            dimension_semantics=("parallel",),
            vmem_limit_bytes=vmem_limit,
        ),
    )(neg_alpha.reshape((1,)), g2d)

    return out2d.reshape(orig_shape)


# ---------------- custom_vjp wiring (gradient reversal semantics) ----------------

@jax.custom_vjp
def rev_grad(x, alpha):
    """Gradient reversal: identity forward, -alpha-scaled gradient backward."""
    return x


def _rev_grad_fwd(x, alpha):
    return x, alpha


def _rev_grad_bwd(alpha, g):
    # x cotangent = -alpha * g (Pallas kernel); alpha gets no gradient (torch returns None).
    return _neg_scale(g, alpha), jnp.zeros_like(alpha)


rev_grad.defvjp(_rev_grad_fwd, _rev_grad_bwd)


class RevGrad:
    """JAX/Pallas port of the PyTorch RevGrad module.

    Forward is identity (single array or tuple of arrays); backward multiplies incoming
    gradients by -alpha. alpha is kept as a runtime f32 scalar (torch stores float64;
    TPU math here is f32), so annealing it per training step does not retrace or
    recompile the backward kernel.
    """

    def __init__(self, alpha=1.0):
        self._alpha = jnp.asarray(alpha, dtype=jnp.float32)

    @property
    def alpha(self):
        return self._alpha

    @alpha.setter
    def alpha(self, value):
        self._alpha = jnp.asarray(value, dtype=jnp.float32)

    def __call__(self, x):
        if isinstance(x, tuple):
            return tuple(rev_grad(t, self._alpha) for t in x)
        return rev_grad(x, self._alpha)


# ---------------- demo / smoke test ----------------

if __name__ == "__main__":
    key = jax.random.PRNGKey(0)
    x = jax.random.normal(key, (2, 4, 16, 16), dtype=jnp.float32)  # NCHW, n=2048 (lane_w=1024)

    layer = RevGrad(alpha=1.0)

    # Forward: identity (free, no kernel).
    y = jax.block_until_ready(layer(x))
    assert y.shape == x.shape and y.dtype == x.dtype
    assert bool(jnp.allclose(y, x)), "forward must be identity"

    # Backward: grad of sum(y) w.r.t. x must be -alpha * ones (runs the Pallas kernel).
    g = jax.block_until_ready(jax.grad(lambda t: jnp.sum(layer(t)))(x))
    assert bool(jnp.allclose(g, -1.0 * jnp.ones_like(x))), "backward must be -alpha * grad"

    # Annealed alpha under one jitted trace: same compile, different runtime alpha values.
    @jax.jit
    def grad_step(t, a):
        return jax.grad(lambda u: jnp.sum(rev_grad(u, a) * 3.0))(t)

    g05 = jax.block_until_ready(grad_step(x, jnp.float32(0.5)))
    g20 = jax.block_until_ready(grad_step(x, jnp.float32(2.0)))   # reuses the same trace/kernel
    assert bool(jnp.allclose(g05, -0.5 * 3.0 * jnp.ones_like(x), atol=1e-6))
    assert bool(jnp.allclose(g20, -2.0 * 3.0 * jnp.ones_like(x), atol=1e-6))

    # Partial trailing block path: 10240 elems -> m=10 rows of 1024, tm=8 -> grid=2 (masked tail).
    x3 = jax.random.normal(jax.random.PRNGKey(1), (4, 10, 8, 32), dtype=jnp.float32)
    d3 = jax.block_until_ready(_neg_scale(x3, 2.0))
    assert bool(jnp.allclose(d3, -2.0 * x3))

    # Narrow-lane path: 1536 elems (divisible by 512, not 1024).
    x4 = jax.random.normal(jax.random.PRNGKey(2), (2, 3, 16, 16), dtype=jnp.float32)
    d4 = jax.block_until_ready(_neg_scale(x4, 0.25))
    assert bool(jnp.allclose(d4, -0.25 * x4))

    # Irregular total size (1155 elems) -> roofline-optimal plain-XLA fallback path.
    layer2 = RevGrad(alpha=0.5)
    x2 = jax.random.normal(jax.random.PRNGKey(3), (3, 5, 7, 11), dtype=jnp.float32)
    g2 = jax.block_until_ready(jax.grad(lambda t: jnp.sum(layer2(t) * 2.0))(x2))
    assert g2.shape == x2.shape
    assert bool(jnp.allclose(g2, -0.5 * 2.0 * jnp.ones_like(x2), atol=1e-6))

    # Tuple input path (matches the torch module's tuple handling).
    y_tup = jax.block_until_ready(layer((x, x * 2.0)))
    assert isinstance(y_tup, tuple) and len(y_tup) == 2
    assert bool(jnp.allclose(y_tup[1], x * 2.0))

    print("KERNEL_OK")
</pallas_src>

<mosaic_0001>
module attributes {stable_mosaic.version = 11 : i64} {
  func.func @_neg_scale_kernel(%arg0: i32, %arg1: memref<1xf32, #tpu.memory_space<smem>>, %arg2: memref<2x1024xf32, #tpu.memory_space<vmem>>, %arg3: memref<2x1024xf32, #tpu.memory_space<vmem>>) attributes {dimension_semantics = [#tpu.dimension_semantics<parallel>], iteration_bounds = array<i64: 1>, scalar_prefetch = 0 : i64, scratch_operands = 0 : i64, tpu.core_type = #tpu.core_type<tc>, window_params = [{transform_indices = @transform_0, window_bounds = array<i64: 1>}, {transform_indices = @transform_1, window_bounds = array<i64: 2, 1024>}, {transform_indices = @transform_2, window_bounds = array<i64: 2, 1024>}]} {
    %c0 = arith.constant 0 : index
    %c0_0 = arith.constant 0 : index
    %0 = vector.load %arg2[%c0, %c0_0] : memref<2x1024xf32, #tpu.memory_space<vmem>>, vector<2x1024xf32>
    %c0_1 = arith.constant 0 : index
    %1 = memref.load %arg1[%c0_1] : memref<1xf32, #tpu.memory_space<smem>>
    %2 = vector.broadcast %1 : f32 to vector<2x1024xf32>
    %3 = arith.mulf %0, %2 : vector<2x1024xf32>
    %c0_2 = arith.constant 0 : index
    %c0_3 = arith.constant 0 : index
    %4 = vector.load %arg3[%c0_2, %c0_3] : memref<2x1024xf32, #tpu.memory_space<vmem>>, vector<2x1024xf32>
    tpu.vector_store %arg3[%c0_2, %c0_3], %3 {strides = array<i32>} : memref<2x1024xf32, #tpu.memory_space<vmem>>, vector<2x1024xf32>,
    return
  }
  func.func @transform_0(%arg0: i32) -> i32 {
    %c0_i32 = arith.constant 0 : i32
    %c0_i32_0 = arith.constant 0 : i32
    return %c0_i32 : i32
  }
  func.func @transform_1(%arg0: i32) -> (i32, i32) {
    %c0_i32 = arith.constant 0 : i32
    %c0_i32_0 = arith.constant 0 : i32
    return %arg0, %c0_i32 : i32, i32
  }
  func.func @transform_2(%arg0: i32) -> (i32, i32) {
    %c0_i32 = arith.constant 0 : i32
    %c0_i32_0 = arith.constant 0 : i32
    return %arg0, %c0_i32 : i32, i32
  }
}

</mosaic_0001>

<bundles_post_ra>
// kernel: tpu_custom_call.1
= control target key start
LH: loop header
LB: loop body
LE: loop exit
PB: predicated region body
PF: predicated region fallthrough
CT: control target
= control target key end

     0   :  { %8 = vsyncpa [#allocation4], 0  ;;  %s142_s0 = inlined_call_operand.<no memory space> [shape: f32[1], index: 0, kind: input, shape index: {}]   ;;  %s143_s1 = inlined_call_operand.hbm [shape: f32[2,1024], index: 1, kind: input, shape index: {}, may-alias: {1,2}]   ;;  %s144_s2 = inlined_call_operand.hbm [shape: f32[2,1024], index: 2, kind: output, shape index: {}, may-alias: {1,2}]  }
   0x1   :  { %9 = vsyncpa [#allocation5], 0  ;;  %s98_s9 = smov [#allocation3]   ;;  %s50_s13 = scalar_lea.hbm %s143_s1, 256 }
   0x2   :  { %s18_s10 = sshll.u32 %s98_s9, 4  ;;  %p51_p0 = scmp.ne.s32.totalorder %s143_s1, %s50_s13  ;;  %s19_s10 = int_to_ptr.vmem [resolvable:$true] %s18_s10 }
   0x3   :  { %p54_p1 = scmp.lt.u32.totalorder %s50_s13, %s143_s1 }
   0x5   :  { %p56_p2 = pnand %p54_p1, %p51_p0 }
   0x7   :  { %59 = shalt.err (!%p56_p2)
}
   0x8   :  { %s60_s18 = scalar_lea.vmem %s19_s10, 256  ;;  %p65_p4 = scmp.lt.s32.totalorder %s19_s10, %s19_s10 }
   0x9   :  { %p61_p3 = scmp.ne.s32.totalorder %s19_s10, %s60_s18  ;;  %p66_p5 = scmp.lt.s32.totalorder %s60_s18, %s60_s18 }
   0xb   :  { %p67_p6 = por %p66_p5, %p65_p4 }
   0xd   :  { %p68_p7 = pnand %p67_p6, %p61_p3 }
   0xf   :  { %71 = shalt.err (!%p68_p7)
}
  0x10   :  { %21 = dma.hbm_to_vmem [thread:$0]  %s143_s1, 256, %s19_s10, [#allocation4]  }
  0x11   :  { %94 = dma.done.wait [#allocation4], 256  }
  0x12   :  { %95 = vsyncadd [#allocation4], 4294967040  ;;  %v28_v0 = vstv %s142_s0  ;;  %s99_s23 = smov [#allocation6]   ;;  %v25_v1 = vld [vmem:[#allocation3] sm:$0xff]  ;;  %v26_v2 = vld [vmem:[#allocation3 + $0x8] sm:$0xff] }
  0x13   :  { %s39_s24 = sshll.u32 %s99_s23, 4  ;;  %v29_v3 = vmul.f32 %v28_v0, %v25_v1  ;;  %v30_v4 = vmul.f32 %v28_v0, %v26_v2  ;;  %s40_s24 = int_to_ptr.vmem [resolvable:$true] %s39_s24 }
  0x14   :  { %s72_s25 = scalar_lea.vmem %s40_s24, 256  ;;  %p77_p9 = scmp.lt.s32.totalorder %s40_s24, %s40_s24 }
  0x15   :  { %31 = vst [vmem:[#allocation6] sm:$0xff] %v29_v3  ;;  %32 = vst [vmem:[#allocation6 + $0x8] sm:$0xff] %v30_v4  ;;  %p73_p8 = scmp.ne.s32.totalorder %s40_s24, %s72_s25  ;;  %p78_p10 = scmp.lt.s32.totalorder %s72_s25, %s72_s25 }
  0x17   :  { %p79_p11 = por %p78_p10, %p77_p9 }
  0x19   :  { %p80_p12 = pnand %p79_p11, %p73_p8 }
  0x1b   :  { %83 = shalt.err (!%p80_p12)
}
  0x1c   :  { %s84_s0 = scalar_lea.hbm %s144_s2, 256 }
  0x1d   :  { %p85_p13 = scmp.ne.s32.totalorder %s144_s2, %s84_s0  ;;  %p88_p0 = scmp.lt.u32.totalorder %s84_s0, %s144_s2 }
  0x1f   :  { %p90_p1 = pnand %p88_p0, %p85_p13 }
  0x21   :  { %93 = shalt.err (!%p90_p1)
}
  0x22   :  { %42 = dma.vmem_to_hbm [thread:$0]  %s40_s24, 256, %s144_s2, [#allocation5]  }
  0x23   :  { %96 = dma.done.wait [#allocation5], 256  }
  0x24   :  { %97 = vsyncadd [#allocation5], 4294967040 }
  0x25   :  { %46 = vsyncpa [#allocation4], 1 }
  0x26   :  { %47 = vsyncpa [#allocation5], 1 }

</bundles_post_ra>
